<compile_context>
chip_gen: v7x
topology: tpu7x:2x2x1
jax: 0.10.0
libtpu: 0.0.40
codegen_flags: <defaults>
</compile_context>

<pallas_src>
import numpy as np
import jax
import jax.numpy as jnp
from jax.experimental import pallas as pl
from jax.experimental.pallas import tpu as pltpu


# ----------------------------------------------------------------------------
# Mel filterbank construction (numpy, identical to the PyTorch reference)
# ----------------------------------------------------------------------------
def hz2mel(hz):
    return 2595.0 * np.log10(1 + hz / 700.0)


def mel2hz(mel):
    return 700.0 * (10.0 ** (mel / 2595.0) - 1)


def get_filterbanks(nfilt=20, nfft=512, samplerate=16000, lowfreq=0, highfreq=None):
    highfreq = highfreq or samplerate / 2
    assert highfreq <= samplerate / 2, "highfreq is greater than samplerate/2"
    lowmel = hz2mel(lowfreq)
    highmel = hz2mel(highfreq)
    melpoints = np.linspace(lowmel, highmel, nfilt + 2)
    bin = np.floor((nfft + 1) * mel2hz(melpoints) / float(samplerate))
    fbank = np.zeros([nfilt, nfft // 2 + 1])
    for j in range(0, nfilt):
        for i in range(int(bin[j]), int(bin[j + 1])):
            fbank[j, i] = (i - bin[j]) / (bin[j + 1] - bin[j])
        for i in range(int(bin[j + 1]), int(bin[j + 2])):
            fbank[j, i] = (bin[j + 2] - i) / (bin[j + 2] - bin[j + 1])
    fbank = fbank[:, 0 : nfft // 2]
    return fbank


def _round_up(x, m):
    return ((x + m - 1) // m) * m


# ----------------------------------------------------------------------------
# Pallas kernel: pre-scale (VPU) -> matmul (MXU) -> clamp/log (EUP) -> affine
# ----------------------------------------------------------------------------
def _fbank_kernel(x_ref, w_ref, c0_ref, c1_ref, o_ref):
    x = x_ref[...].astype(jnp.float32)
    x = 10000.0 * x * x                                              # 10000 * x**2
    y = jnp.dot(x, w_ref[...], preferred_element_type=jnp.float32)   # x @ W.T (padded lanes)
    y = jnp.maximum(y, 1e-13)                                        # clamp(min=1e-13)
    # (log(y)/10 + cmvn0) * cmvn1  ==  (log(y) + 10*cmvn0) * (cmvn1/10) == (log(y)+c0)*c1
    y = (jnp.log(y) + c0_ref[...]) * c1_ref[...]
    o_ref[...] = y.astype(o_ref.dtype)


def fbank_forward(audio_spect, w_pad, c0, c1, *, tile_m=1024):
    """audio_spect: (..., in_size) any float dtype
       w_pad:       (in_size, n_pad) f32  (pre-transposed, lane-padded weight)
       c0, c1:      (1, n_pad) f32 folded affine constants
    returns (..., n_pad) in audio_spect.dtype (caller slices to out_size)."""
    in_size = audio_spect.shape[-1]
    n_pad = w_pad.shape[1]
    lead_shape = audio_spect.shape[:-1]
    m_total = int(np.prod(lead_shape)) if lead_shape else 1

    x2d = audio_spect.reshape(m_total, in_size)     # no dtype upcast, no row padding

    # Row tile: as large as reasonable (per-grid-step overhead ~0.35us), multiple of
    # 16 so both f32 and bf16 sublane layouts are legal. Pallas masks the trailing
    # partial block, so no jnp.pad copy of the activation is needed.
    tm = min(int(tile_m), _round_up(m_total, 16))
    grid = (pl.cdiv(m_total, tm),)

    out2d = pl.pallas_call(
        _fbank_kernel,
        out_shape=jax.ShapeDtypeStruct((m_total, n_pad), audio_spect.dtype),
        grid_spec=pltpu.PrefetchScalarGridSpec(
            num_scalar_prefetch=0,
            grid=grid,
            in_specs=[
                pl.BlockSpec((tm, in_size), lambda i: (i, 0)),       # streaming x rows
                pl.BlockSpec((in_size, n_pad), lambda i: (0, 0)),    # full (padded) weight
                pl.BlockSpec((1, n_pad), lambda i: (0, 0)),          # folded cmvn add
                pl.BlockSpec((1, n_pad), lambda i: (0, 0)),          # folded cmvn scale
            ],
            out_specs=pl.BlockSpec((tm, n_pad), lambda i: (i, 0)),   # lane-dense output
        ),
        compiler_params=pltpu.CompilerParams(
            dimension_semantics=("parallel",),
        ),
    )(x2d, w_pad, c0, c1)

    return out2d.reshape(*lead_shape, n_pad)


# ----------------------------------------------------------------------------
# FbankBaseModel equivalent: deterministic parameter construction
# ----------------------------------------------------------------------------
class FbankBaseModelPallas:
    LANE = 128  # output lane padding target (full vreg lane width)

    def __init__(self, in_size, out_size):
        fb = get_filterbanks(nfilt=out_size, nfft=512, samplerate=16000,
                             lowfreq=80, highfreq=8000)
        fb[1, 4] = 1.0
        assert fb.shape[1] == in_size, \
            "Linear weight comes from get_filterbanks with nfft=512 -> in_size must be 256"
        self.in_size = in_size
        self.out_size = out_size
        self.n_pad = _round_up(out_size, self.LANE)

        # PyTorch-layout weight kept for reference checking.
        self.weight = jnp.asarray(fb, jnp.float32)                   # (out_size, in_size)
        # Pre-transposed + zero lane-padded weight used by the kernel.
        w_pad = np.zeros((in_size, self.n_pad), np.float32)
        w_pad[:, :out_size] = fb.T
        self.w_pad = jnp.asarray(w_pad)                              # (in_size, n_pad)

        # Identity-cmvn folded constants: (log(y) + 0) * 0.1  == log(y)/10
        self._c0_id = jnp.zeros((1, self.n_pad), jnp.float32)
        self._c1_id = jnp.full((1, self.n_pad), 0.1, jnp.float32)

    def __call__(self, audio_spect, fbank_cmvn=None, *, tile_m=1024):
        if fbank_cmvn is None:
            c0, c1 = self._c0_id, self._c1_id
        else:
            cm = jnp.asarray(fbank_cmvn, jnp.float32)
            # Fold /10 and cmvn:  (log/10 + cm0) * cm1 == (log + 10*cm0) * (cm1/10)
            c0 = self._c0_id.at[0, : self.out_size].set(10.0 * cm[0, :])
            c1 = self._c1_id.at[0, : self.out_size].set(0.1 * cm[1, :])
        out = fbank_forward(audio_spect, self.w_pad, c0, c1, tile_m=tile_m)
        return out[..., : self.out_size]


if __name__ == "__main__":
    in_size, out_size = 256, 32
    B, T = 2, 8

    key = jax.random.PRNGKey(0)
    k1, k2 = jax.random.split(key)
    audio_spect = jax.random.uniform(k1, (B, T, in_size), jnp.float32)
    fbank_cmvn = jax.random.normal(k2, (2, out_size), jnp.float32)

    model = FbankBaseModelPallas(in_size, out_size)

    # no-cmvn path
    out = model(audio_spect)
    out = jax.block_until_ready(out)

    # cmvn path
    out_cmvn = model(audio_spect, fbank_cmvn)
    out_cmvn = jax.block_until_ready(out_cmvn)

    # reference check in plain JAX (original semantics)
    x = 10000.0 * audio_spect ** 2
    ref = jnp.maximum(x @ model.weight.T, 1e-13)
    ref = jnp.log(ref) / 10.0
    ref_cmvn = (ref + fbank_cmvn[0, :]) * fbank_cmvn[1, :]
    assert out.shape == (B, T, out_size)
    assert jnp.allclose(out, ref, rtol=1e-5, atol=1e-5)
    assert jnp.allclose(out_cmvn, ref_cmvn, rtol=1e-5, atol=1e-5)

    print("KERNEL_OK")
</pallas_src>

<mosaic_0001>
module attributes {stable_mosaic.version = 11 : i64} {
  func.func @_fbank_kernel(%arg0: i32, %arg1: memref<16x256xf32, #tpu.memory_space<vmem>>, %arg2: memref<256x128xf32, #tpu.memory_space<vmem>>, %arg3: memref<1x128xf32, #tpu.memory_space<vmem>>, %arg4: memref<1x128xf32, #tpu.memory_space<vmem>>, %arg5: memref<16x128xf32, #tpu.memory_space<vmem>>) attributes {dimension_semantics = [#tpu.dimension_semantics<parallel>], iteration_bounds = array<i64: 1>, scalar_prefetch = 0 : i64, scratch_operands = 0 : i64, tpu.core_type = #tpu.core_type<tc>, window_params = [{transform_indices = @transform_0, window_bounds = array<i64: 16, 256>}, {pipeline_mode = #tpu.pipeline_mode<synchronous>, transform_indices = @transform_1, window_bounds = array<i64: 256, 128>}, {pipeline_mode = #tpu.pipeline_mode<synchronous>, transform_indices = @transform_2, window_bounds = array<i64: 1, 128>}, {pipeline_mode = #tpu.pipeline_mode<synchronous>, transform_indices = @transform_3, window_bounds = array<i64: 1, 128>}, {transform_indices = @transform_4, window_bounds = array<i64: 16, 128>}]} {
    %c0 = arith.constant 0 : index
    %c0_0 = arith.constant 0 : index
    %0 = vector.load %arg1[%c0, %c0_0] : memref<16x256xf32, #tpu.memory_space<vmem>>, vector<16x256xf32>
    %cst = arith.constant 1.000000e+04 : f32
    %1 = vector.broadcast %cst : f32 to vector<16x256xf32>
    %2 = arith.mulf %1, %0 : vector<16x256xf32>
    %3 = arith.mulf %2, %0 : vector<16x256xf32>
    %c0_1 = arith.constant 0 : index
    %c0_2 = arith.constant 0 : index
    %4 = vector.load %arg2[%c0_1, %c0_2] : memref<256x128xf32, #tpu.memory_space<vmem>>, vector<256x128xf32>
    %cst_3 = arith.constant dense<0.000000e+00> : vector<16x128xf32>
    %5 = tpu.matmul %3, %4, %cst_3 {dimension_numbers = #tpu.dot_dimension_numbers<[1], [0], [0], [1], [0, 0, 1, 1], [], []>} : vector<16x256xf32>, vector<256x128xf32>, vector<16x128xf32> -> vector<16x128xf32>
    %cst_4 = arith.constant 9.99999982E-14 : f32
    %6 = vector.broadcast %cst_4 : f32 to vector<16x128xf32>
    %7 = arith.maximumf %5, %6 : vector<16x128xf32>
    %8 = math.log %7 : vector<16x128xf32>
    %c0_5 = arith.constant 0 : index
    %c0_6 = arith.constant 0 : index
    %9 = vector.load %arg3[%c0_5, %c0_6] : memref<1x128xf32, #tpu.memory_space<vmem>>, vector<1x128xf32>
    %10 = vector.broadcast %9 : vector<1x128xf32> to vector<16x128xf32>
    %11 = arith.addf %8, %10 : vector<16x128xf32>
    %c0_7 = arith.constant 0 : index
    %c0_8 = arith.constant 0 : index
    %12 = vector.load %arg4[%c0_7, %c0_8] : memref<1x128xf32, #tpu.memory_space<vmem>>, vector<1x128xf32>
    %13 = vector.broadcast %12 : vector<1x128xf32> to vector<16x128xf32>
    %14 = arith.mulf %11, %13 : vector<16x128xf32>
    %c0_9 = arith.constant 0 : index
    %c0_10 = arith.constant 0 : index
    %15 = vector.load %arg5[%c0_9, %c0_10] : memref<16x128xf32, #tpu.memory_space<vmem>>, vector<16x128xf32>
    tpu.vector_store %arg5[%c0_9, %c0_10], %14 {strides = array<i32>} : memref<16x128xf32, #tpu.memory_space<vmem>>, vector<16x128xf32>,
    return
  }
  func.func @transform_0(%arg0: i32) -> (i32, i32) {
    %c0_i32 = arith.constant 0 : i32
    %c0_i32_0 = arith.constant 0 : i32
    return %arg0, %c0_i32 : i32, i32
  }
  func.func @transform_1(%arg0: i32) -> (i32, i32) {
    %c0_i32 = arith.constant 0 : i32
    %c0_i32_0 = arith.constant 0 : i32
    %c0_i32_1 = arith.constant 0 : i32
    return %c0_i32, %c0_i32_0 : i32, i32
  }
  func.func @transform_2(%arg0: i32) -> (i32, i32) {
    %c0_i32 = arith.constant 0 : i32
    %c0_i32_0 = arith.constant 0 : i32
    %c0_i32_1 = arith.constant 0 : i32
    return %c0_i32, %c0_i32_0 : i32, i32
  }
  func.func @transform_3(%arg0: i32) -> (i32, i32) {
    %c0_i32 = arith.constant 0 : i32
    %c0_i32_0 = arith.constant 0 : i32
    %c0_i32_1 = arith.constant 0 : i32
    return %c0_i32, %c0_i32_0 : i32, i32
  }
  func.func @transform_4(%arg0: i32) -> (i32, i32) {
    %c0_i32 = arith.constant 0 : i32
    %c0_i32_0 = arith.constant 0 : i32
    return %arg0, %c0_i32 : i32, i32
  }
}

</mosaic_0001>

<bundles_post_ra>
// kernel: tpu_custom_call.1
= control target key start
LH: loop header
LB: loop body
LE: loop exit
PB: predicated region body
PF: predicated region fallthrough
CT: control target
= control target key end

     0   :  { %9 = vsyncpa [#allocation3], 0  ;;  %s460_s0 = inlined_call_operand.hbm [shape: f32[16,256], index: 0, kind: input, shape index: {}]   ;;  %s461_s1 = inlined_call_operand.hbm [shape: f32[256,128], index: 1, kind: input, shape index: {}]   ;;  %s462_s2 = inlined_call_operand.vmem [shape: f32[1,128], index: 2, kind: input, shape index: {}]   ;;  %s463_s3 = inlined_call_operand.vmem [shape: f32[1,128], index: 3, kind: input, shape index: {}]   ;;  %s464_s4 = inlined_call_operand.hbm [shape: f32[16,128], index: 4, kind: output, shape index: {}]  }
   0x1   :  { %10 = vsyncpa [#allocation6], 0 }
   0x2   :  { %11 = vsyncpa [#allocation4], 0  ;;  %s380_s15 = smov [#allocation2]   ;;  %s308_s19 = scalar_lea.hbm %s460_s0, 512 }
   0x3   :  { %s17_s16 = sshll.u32 %s380_s15, 4  ;;  %p309_p0 = scmp.ne.s32.totalorder %s460_s0, %s308_s19  ;;  %s18_s16 = int_to_ptr.vmem [resolvable:$true] %s17_s16 }
   0x4   :  { %p312_p1 = scmp.lt.u32.totalorder %s308_s19, %s460_s0 }
   0x6   :  { %p314_p2 = pnand %p312_p1, %p309_p0 }
   0x8   :  { %317 = shalt.err (!%p314_p2)
}
   0x9   :  { %s318_s24 = scalar_lea.vmem %s18_s16, 512  ;;  %p323_p4 = scmp.lt.s32.totalorder %s18_s16, %s18_s16 }
   0xa   :  { %p319_p3 = scmp.ne.s32.totalorder %s18_s16, %s318_s24  ;;  %p324_p5 = scmp.lt.s32.totalorder %s318_s24, %s318_s24 }
   0xc   :  { %p325_p6 = por %p324_p5, %p323_p4 }
   0xe   :  { %p326_p7 = pnand %p325_p6, %p319_p3 }
  0x10   :  { %329 = shalt.err (!%p326_p7)
}
  0x11   :  { %s381_s25 = smov 256   ;;  %s382_s26 = smov 16  }
  0x12   :  { %23 = dma.hbm_to_vmem [thread:$0]  %s460_s0, 512, %s18_s16, [#allocation3], %s381_s25, %s381_s25, %s382_s26  }
  0x13   :  { %s383_s29 = smov [#allocation5]   ;;  %s330_s7 = scalar_lea.hbm %s461_s1, 4096 }
  0x14   :  { %s29_s30 = sshll.u32 %s383_s29, 4  ;;  %p331_p8 = scmp.ne.s32.totalorder %s461_s1, %s330_s7  ;;  %s30_s30 = int_to_ptr.vmem [resolvable:$true] %s29_s30 }
  0x15   :  { %p334_p9 = scmp.lt.u32.totalorder %s330_s7, %s461_s1 }
  0x17   :  { %p336_p10 = pnand %p334_p9, %p331_p8 }
  0x19   :  { %339 = shalt.err (!%p336_p10)
}
  0x1a   :  { %s340_s12 = scalar_lea.vmem %s30_s30, 4096  ;;  %p345_p12 = scmp.lt.s32.totalorder %s30_s30, %s30_s30 }
  0x1b   :  { %p341_p11 = scmp.ne.s32.totalorder %s30_s30, %s340_s12  ;;  %p346_p13 = scmp.lt.s32.totalorder %s340_s12, %s340_s12 }
  0x1d   :  { %p347_p0 = por %p346_p13, %p345_p12 }
  0x1f   :  { %p348_p1 = pnand %p347_p0, %p341_p11 }
  0x21   :  { %351 = shalt.err (!%p348_p1)
}
  0x22   :  { %s384_s0 = smov 128   ;;  %s385_s13 = smov 8  }
  0x23   :  { %35 = dma.hbm_to_vmem [thread:$0]  %s461_s1, 4096, %s30_s30, [#allocation6], %s384_s0, %s384_s0, %s385_s13  }
  0x24   :  { %374 = dma.done.wait [#allocation3], 512  }
  0x25   :  { %375 = vsyncadd [#allocation3], 4294966784 }
  0x26   :  { %376 = dma.done.wait [#allocation6], 4096  }
  0x27   :  { %377 = vsyncadd [#allocation6], 4294963200  ;;  %v74_v0 = vld [vmem:[#allocation5 + $0x80] sm:$0xff]  ;;  %v75_v1 = vld [vmem:[#allocation5 + $0x88] sm:$0xff]  ;;  %s386_s19 = smov [#allocation7]  }
  0x28   :  { %v58_v2 = vld [vmem:[#allocation5] sm:$0xff]  ;;  %v249_v3 = vpack.c.bf16 %v75_v1, %v74_v0  ;;  %v59_v4 = vld [vmem:[#allocation5 + $0x8] sm:$0xff]  ;;  %v76_v5 = vld [vmem:[#allocation5 + $0x90] sm:$0xff]  ;;  %s196_s20 = sshll.u32 %s386_s19, 4  ;;  %s197_s20 = int_to_ptr.vmem [resolvable:$true] %s196_s20 }
  0x29   :  { %v77_v6 = vld [vmem:[#allocation5 + $0x98] sm:$0xff]  ;;  %v251_v7 = vpack.c.bf16 %v59_v4, %v58_v2  ;;  %v60_v9 = vld [vmem:[#allocation5 + $0x10] sm:$0xff]  ;;  %v78_v11 = vld [vmem:[#allocation5 + $0xa0] sm:$0xff]  ;;  %s352_s21 = scalar_lea.vmem %s197_s20, 256  ;;  %p357_p3 = scmp.lt.s32.totalorder %s197_s20, %s197_s20 }
  0x2a   :  { %v253_v8 = vpack.c.bf16 %v77_v6, %v76_v5  ;;  %v61_v10 = vld [vmem:[#allocation5 + $0x18] sm:$0xff]  ;;  %250 = vmatprep.subr.bf16.mxu0 %v249_v3  ;;  %281 = vmatprep.subr.bf16.mxu1 %v249_v3  ;;  %v79_v12 = vld [vmem:[#allocation5 + $0xa8] sm:$0xff]  ;;  %v62_v15 = vld [vmem:[#allocation5 + $0x20] sm:$0xff]  ;;  %p353_p2 = scmp.ne.s32.totalorder %s197_s20, %s352_s21  ;;  %p358_p4 = scmp.lt.s32.totalorder %s352_s21, %s352_s21 }
  0x2b   :  { %252 = vmatpush3.bf16.msra.mxu0 %v251_v7  ;;  %289 = vmatpush3.bf16.msra.mxu1 %v251_v7  ;;  %v255_v13 = vpack.c.bf16 %v61_v10, %v60_v9  ;;  %v257_v14 = vpack.c.bf16 %v79_v12, %v78_v11  ;;  %v63_v16 = vld [vmem:[#allocation5 + $0x28] sm:$0xff]  ;;  %v80_v17 = vld [vmem:[#allocation5 + $0xb0] sm:$0xff]  ;;  %v81_v18 = vld [vmem:[#allocation5 + $0xb8] sm:$0xff] }
  0x2c   :  { %254 = vmatprep.subr.bf16.mxu0 %v253_v8  ;;  %282 = vmatprep.subr.bf16.mxu1 %v253_v8  ;;  %v259_v19 = vpack.c.bf16 %v63_v16, %v62_v15  ;;  %v261_v20 = vpack.c.bf16 %v81_v18, %v80_v17  ;;  %v64_v21 = vld [vmem:[#allocation5 + $0x30] sm:$0xff]  ;;  %v65_v22 = vld [vmem:[#allocation5 + $0x38] sm:$0xff]  ;;  %v82_v23 = vld [vmem:[#allocation5 + $0xc0] sm:$0xff]  ;;  %p359_p5 = por %p358_p4, %p357_p3 }
  0x2d   :  { %v83_v24 = vld [vmem:[#allocation5 + $0xc8] sm:$0xff]  ;;  %v49_v27 = vld [vmem:[#allocation2 + $0x18] sm:$0xff]  ;;  %v263_v28 = vpack.c.bf16 %v65_v22, %v64_v21  ;;  %v66_v31 = vld [vmem:[#allocation5 + $0x40] sm:$0xff] }
  0x2e   :  { %v47_v25 = vld [vmem:[#allocation2 + $0x8] sm:$0xff]  ;;  %v53_v29 = vmul.f32 10000.0, %v49_v27  ;;  %v265_v30 = vpack.c.bf16 %v83_v24, %v82_v23  ;;  %v84_v34 = vld [vmem:[#allocation5 + $0xd0] sm:$0xff]  ;;  %v85_v35 = vld [vmem:[#allocation5 + $0xd8] sm:$0xff]  ;;  %p360_p6 = pnand %p359_p5, %p353_p2 }
  0x2f   :  { %256 = vmatpush3.bf16.msra.mxu0 %v255_v13  ;;  %290 = vmatpush3.bf16.msra.mxu1 %v255_v13  ;;  %v51_v26 = vmul.f32 10000.0, %v47_v25  ;;  %v67_v32 = vld [vmem:[#allocation5 + $0x48] sm:$0xff]  ;;  %v269_v38 = vpack.c.bf16 %v85_v35, %v84_v34  ;;  %v68_v39 = vld [vmem:[#allocation5 + $0x50] sm:$0xff]  ;;  %v69_v40 = vld [vmem:[#allocation5 + $0x58] sm:$0xff] }
  0x30   :  { %258 = vmatprep.subr.bf16.mxu0 %v257_v14  ;;  %283 = vmatprep.subr.bf16.mxu1 %v257_v14  ;;  %v57_v36 = vmul.f32 %v53_v29, %v49_v27  ;;  %v267_v37 = vpack.c.bf16 %v67_v32, %v66_v31  ;;  %v86_v41 = vld [vmem:[#allocation5 + $0xe0] sm:$0xff]  ;;  %v87_v42 = vld [vmem:[#allocation5 + $0xe8] sm:$0xff]  ;;  %v271_v43 = vpack.c.bf16 %v69_v40, %v68_v39  ;;  %v88_v47 = vld [vmem:[#allocation5 + $0xf0] sm:$0xff] }
  0x31   :  { %v55_v33 = vmul.f32 %v51_v26, %v47_v25  ;;  %v273_v44 = vpack.c.bf16 %v87_v42, %v86_v41  ;;  %v70_v45 = vld [vmem:[#allocation5 + $0x60] sm:$0xff]  ;;  %v71_v46 = vld [vmem:[#allocation5 + $0x68] sm:$0xff]  ;;  %v89_v48 = vld [vmem:[#allocation5 + $0xf8] sm:$0xff] }
  0x32   :  { %159 = vmatprep.mubr.f32.mxu1 %v57_v36  ;;  %v275_v49 = vpack.c.bf16 %v71_v46, %v70_v45  ;;  %v46_v50 = vld [vmem:[#allocation2] sm:$0xff]  ;;  %v48_v51 = vld [vmem:[#allocation2 + $0x10] sm:$0xff]  ;;  %v277_v52 = vpack.c.bf16 %v89_v48, %v88_v47  ;;  %v73_v54 = vld [vmem:[#allocation5 + $0x78] sm:$0xff] }
  0x33   :  { %260 = vmatpush3.bf16.msra.mxu0 %v259_v19  ;;  %291 = vmatpush3.bf16.msra.mxu1 %v259_v19  ;;  %v72_v53 = vld [vmem:[#allocation5 + $0x70] sm:$0xff]  ;;  %v50_v55 = vmul.f32 10000.0, %v46_v50  ;;  %v52_v56 = vmul.f32 10000.0, %v48_v51  ;;  %v209_v5 = vld [vmem:[%s462_s2] ss:$0 sm:$0xff] }
  0x34   :  { %262 = vmatprep.subr.bf16.mxu0 %v261_v20  ;;  %284 = vmatprep.subr.bf16.mxu1 %v261_v20  ;;  %v279_v57 = vpack.c.bf16 %v73_v54, %v72_v53  ;;  %v210_v9 = vld [vmem:[%s463_s3] ss:$0 sm:$0xff] }
  0x35   :  { %154 = vmatprep.mubr.f32.mxu0 %v55_v33  ;;  %v54_v58 = vmul.f32 %v50_v55, %v46_v50  ;;  %v56_v59 = vmul.f32 %v52_v56, %v48_v51 }
  0x37   :  { %264 = vmatpush3.bf16.msra.mxu0 %v263_v28  ;;  %292 = vmatpush3.bf16.msra.mxu1 %v263_v28 }
  0x38   :  { %266 = vmatprep.subr.bf16.mxu0 %v265_v30  ;;  %285 = vmatprep.subr.bf16.mxu1 %v265_v30 }
  0x3b   :  { %268 = vmatpush3.bf16.msra.mxu0 %v267_v37  ;;  %293 = vmatpush3.bf16.msra.mxu1 %v267_v37 }
  0x3c   :  { %270 = vmatprep.subr.bf16.mxu0 %v269_v38  ;;  %286 = vmatprep.subr.bf16.mxu1 %v269_v38 }
  0x3f   :  { %272 = vmatpush3.bf16.msra.mxu0 %v271_v43  ;;  %294 = vmatpush3.bf16.msra.mxu1 %v271_v43 }
  0x40   :  { %274 = vmatprep.subr.bf16.mxu0 %v273_v44  ;;  %287 = vmatprep.subr.bf16.mxu1 %v273_v44 }
  0x43   :  { %276 = vmatpush3.bf16.msra.mxu0 %v275_v49  ;;  %295 = vmatpush3.bf16.msra.mxu1 %v275_v49 }
  0x44   :  { %278 = vmatprep.subr.bf16.mxu0 %v277_v52  ;;  %288 = vmatprep.subr.bf16.mxu1 %v277_v52 }
  0x47   :  { %280 = vmatpush3.bf16.msra.mxu0 %v279_v57  ;;  %296 = vmatpush3.bf16.msra.mxu1 %v279_v57 }
  0x4a   :  { %155 = vmatmul.mubr.f32.vlgmr.msra.gmra.mrb[0].mxu0 %v54_v58  ;;  %160 = vmatmul.mubr.f32.vlgmr.msra.gmra.mrb[0].mxu1 %v56_v59 }
 0x11d   :  { %v243_v60 = vpop.f32.mrb[0].mxu0  ;;  %v246_v61 = vpop.f32.mrb[0].mxu1 }
 0x11e   :  { %v244_v62 = vpop.f32.mrb[1].mxu0  ;;  %v247_v63 = vpop.f32.mrb[1].mxu1 }
 0x11f   :  { %v245_v0 = vadd.f32 %v244_v62, %v243_v60  ;;  %v248_v1 = vadd.f32 %v247_v63, %v246_v61 }
 0x121   :  { %v165_v2 = vmax.f32 %v245_v0, 1e-13  ;;  %v166_v3 = vmax.f32 %v248_v1, 1e-13 }
 0x123   :  { %304 = vlog2.f32 %v165_v2 }
 0x124   :  { %306 = vlog2.f32 %v166_v3 }
 0x12d   :  { %v305_v4 = vpop.eup %304 }
 0x12e   :  { %v307_v6 = vpop.eup %306  ;;  %v168_v7 = vmul.f32 0.6931472, %v305_v4 }
 0x12f   :  { %v170_v8 = vmul.f32 0.6931472, %v307_v6 }
 0x130   :  { %v178_v10 = vadd.f32 %v209_v5, %v168_v7 }
 0x131   :  { %v179_v11 = vadd.f32 %v209_v5, %v170_v8 }
 0x132   :  { %v187_v12 = vmul.f32 %v210_v9, %v178_v10 }
 0x133   :  { %v188_v13 = vmul.f32 %v210_v9, %v179_v11 }
 0x134   :  { %189 = vst [vmem:[#allocation7] sm:$0xff] %v187_v12 }
 0x135   :  { %190 = vst [vmem:[#allocation7 + $0x8] sm:$0xff] %v188_v13 }
 0x136   :  { %363 = shalt.err (!%p360_p6)
}
 0x137   :  { %s364_s3 = scalar_lea.hbm %s464_s4, 256 }
 0x138   :  { %p365_p7 = scmp.ne.s32.totalorder %s464_s4, %s364_s3  ;;  %p368_p8 = scmp.lt.u32.totalorder %s364_s3, %s464_s4 }
 0x13a   :  { %p370_p9 = pnand %p368_p8, %p365_p7 }
 0x13c   :  { %373 = shalt.err (!%p370_p9)
}
 0x13d   :  { %202 = dma.vmem_to_hbm [thread:$0]  %s197_s20, 256, %s464_s4, [#allocation4], %s384_s0, %s384_s0, %s385_s13  }
 0x13e   :  { %378 = dma.done.wait [#allocation4], 256  }
 0x13f   :  { %379 = vsyncadd [#allocation4], 4294967040 }
 0x140   :  { %206 = vsyncpa [#allocation3], 1 }
 0x141   :  { %207 = vsyncpa [#allocation6], 1 }
 0x142   :  { %208 = vsyncpa [#allocation4], 1 }

</bundles_post_ra>
